<compile_context>
chip_gen: v6e
topology: v6e:2x2x1
jax: 0.10.0
libtpu: 0.0.40
codegen_flags: <defaults>
</compile_context>

<pallas_src>
import functools

import jax
import jax.numpy as jnp
from jax.experimental import pallas as pl
from jax.experimental.pallas import tpu as pltpu


# --------------------------------------------------------------------------- #
# Shared accumulation step:  acc += A[i, k] @ R[k]   (skip empty A tiles)
# --------------------------------------------------------------------------- #
def _accumulate(mask_ref, a_ref, r_ref, acc_ref):
    i = pl.program_id(0)
    k = pl.program_id(1)
    n_k = pl.num_programs(1)

    @pl.when(k == 0)
    def _():
        acc_ref[...] = jnp.zeros_like(acc_ref)

    # Skip MXU work for all-zero adjacency tiles (mask is scalar-prefetched
    # into SMEM, flattened to 1-D to avoid SMEM 2-D padding waste).
    # TODO(synk): use a data-dependent index_map over compacted nonzero tiles to
    # also skip the HBM traffic for empty tiles (real-graph sparsity).
    @pl.when(mask_ref[i * n_k + k] != 0)
    def _():
        acc_ref[...] += jnp.dot(
            a_ref[...], r_ref[...], preferred_element_type=jnp.float32
        )


def _gcn_layer1_kernel(mask_ref, a_ref, r_ref, b_ref, w2_ref, o_ref, acc_ref):
    # o = relu(A_hat @ R + b1) @ W2   (bf16 out -> becomes layer-2 RHS directly)
    _accumulate(mask_ref, a_ref, r_ref, acc_ref)

    @pl.when(pl.program_id(1) == pl.num_programs(1) - 1)
    def _():
        h = jnp.maximum(acc_ref[...] + b_ref[...], 0.0)
        o_ref[...] = jnp.dot(
            h, w2_ref[...], preferred_element_type=jnp.float32
        ).astype(o_ref.dtype)


def _gcn_layer2_kernel(mask_ref, a_ref, r_ref, b_ref, o_ref, acc_ref):
    # o = A_hat @ R + b2   (f32 out)
    _accumulate(mask_ref, a_ref, r_ref, acc_ref)

    @pl.when(pl.program_id(1) == pl.num_programs(1) - 1)
    def _():
        o_ref[...] = (acc_ref[...] + b_ref[...]).astype(o_ref.dtype)


# --------------------------------------------------------------------------- #
# Wrapper for one aggregation pass.
# --------------------------------------------------------------------------- #
def _gcn_layer(a_bf16, tile_mask, rhs_bf16, bias_f32, w2_pad, *, tm, tk):
    npad = a_bf16.shape[0]
    fpad = rhs_bf16.shape[1]
    n_i = npad // tm
    n_k = npad // tk
    fused = w2_pad is not None

    in_specs = [
        pl.BlockSpec((tm, tk), lambda i, k, m: (i, k)),      # A_hat tile
        pl.BlockSpec((tk, fpad), lambda i, k, m: (k, 0)),    # RHS k-slab
        pl.BlockSpec((1, fpad), lambda i, k, m: (0, 0)),     # bias row (resident)
    ]
    operands = [tile_mask, a_bf16, rhs_bf16, bias_f32]
    if fused:
        in_specs.append(pl.BlockSpec((fpad, fpad), lambda i, k, m: (0, 0)))  # W2
        operands.append(w2_pad)
        kernel = _gcn_layer1_kernel
        out_dtype = jnp.bfloat16
    else:
        kernel = _gcn_layer2_kernel
        out_dtype = jnp.float32

    flops = 2 * npad * npad * fpad + (2 * npad * fpad * fpad if fused else 0)
    bytes_accessed = (
        npad * npad * 2                          # A_hat (bf16)
        + npad * fpad * 2                        # RHS   (bf16)
        + npad * fpad * (2 if fused else 4)      # output
        + fpad * 4                               # bias
        + (fpad * fpad * 4 if fused else 0)      # W2
    )

    return pl.pallas_call(
        kernel,
        out_shape=jax.ShapeDtypeStruct((npad, fpad), out_dtype),
        grid_spec=pltpu.PrefetchScalarGridSpec(
            num_scalar_prefetch=1,                      # tile occupancy mask
            grid=(n_i, n_k),
            in_specs=in_specs,
            out_specs=pl.BlockSpec((tm, fpad), lambda i, k, m: (i, 0)),
            scratch_shapes=[pltpu.VMEM((tm, fpad), jnp.float32)],
        ),
        compiler_params=pltpu.CompilerParams(
            dimension_semantics=("parallel", "arbitrary"),
            vmem_limit_bytes=32 * 1024 * 1024,
        ),
        cost_estimate=pl.CostEstimate(
            flops=flops, transcendentals=0, bytes_accessed=bytes_accessed
        ),
    )(*operands)


# --------------------------------------------------------------------------- #
# Glue (plain JAX)
# --------------------------------------------------------------------------- #
def _round_up(x, m):
    return ((x + m - 1) // m) * m


def _choose_tiles(npad0):
    # Sized for the smallest VMEM target (v7x: 64 MiB phys / 32 MiB scoped).
    if npad0 >= 1024 and npad0 % 1024 == 0:
        tm, tk = 512, 1024          # 1 MiB bf16 A tile per buffer
    elif npad0 >= 512:
        tm, tk = 256, 512
    else:
        tm, tk = npad0, npad0       # npad0 is already a multiple of 128
    npad = _round_up(npad0, tk)     # tk is a multiple of tm
    return npad, tm, tk


def _pad2d(x, rows, cols):
    r, c = x.shape
    return jnp.pad(x, ((0, rows - r), (0, cols - c)))


def _normalized_adjacency(n, edge_index):
    # Dense GCN-normalized adjacency with self-loops (A[dst, src]).
    src, dst = edge_index[0], edge_index[1]
    a = jnp.zeros((n, n), jnp.float32).at[dst, src].set(1.0)
    a = a + jnp.eye(n, dtype=jnp.float32)
    deg = a.sum(axis=1)
    dinv = jnp.where(deg > 0, 1.0 / jnp.sqrt(deg), 0.0)
    return dinv[:, None] * a * dinv[None, :]


def gcn_two_layer(x, edge_index, w1, b1, w2, b2):
    """ModelGraph.forward: conv1(x, ei).relu() -> conv2(x, ei)."""
    n = x.shape[0]
    hid = w1.shape[1]
    fout = w2.shape[1]

    a_hat = _normalized_adjacency(n, edge_index)

    npad0 = _round_up(n, 128)
    npad, tm, tk = _choose_tiles(npad0)
    fpad = _round_up(max(hid, fout), 128)

    a_p = _pad2d(a_hat, npad, npad)
    n_i, n_k = npad // tm, npad // tk
    tile_mask = (
        (a_p.reshape(n_i, tm, n_k, tk) != 0.0)
        .any(axis=(1, 3))
        .reshape(-1)
        .astype(jnp.int32)
    )
    a_bf16 = a_p.astype(jnp.bfloat16)

    # Hoisted tiny feature transform (in_channels << n): X @ W1 once.
    xw1 = x.astype(jnp.float32) @ w1.astype(jnp.float32)          # (n, hid)
    xw1_p = _pad2d(xw1, npad, fpad).astype(jnp.bfloat16)
    b1_p = jnp.pad(b1.astype(jnp.float32), (0, fpad - hid)).reshape(1, fpad)
    b2_p = jnp.pad(b2.astype(jnp.float32), (0, fpad - fout)).reshape(1, fpad)
    w2_p = _pad2d(w2.astype(jnp.float32), fpad, fpad)

    # Layer 1 (fused epilogue): R2 = relu(A_hat @ (X W1) + b1) @ W2   (bf16)
    # Padded rows of R2 are harmless: the corresponding A_hat columns are zero.
    r2 = _gcn_layer(a_bf16, tile_mask, xw1_p, b1_p, w2_p, tm=tm, tk=tk)

    # Layer 2: Out = A_hat @ R2 + b2
    out_p = _gcn_layer(a_bf16, tile_mask, r2, b2_p, None, tm=tm, tk=tk)

    return out_p[:n, :fout]


def gcn_two_layer_ref(x, edge_index, w1, b1, w2, b2):
    # Pure-JAX f32 reference.
    a_hat = _normalized_adjacency(x.shape[0], edge_index)
    h = jax.nn.relu(a_hat @ (x @ w1) + b1)
    return a_hat @ (h @ w2) + b2


if __name__ == "__main__":
    N = 16            # nodes
    IN_CH = 4
    HIDDEN_CH = 32
    OUT_CH = 8

    key = jax.random.PRNGKey(0)
    kx, kw1, kb1, kw2, kb2 = jax.random.split(key, 5)

    x = jax.random.normal(kx, (N, IN_CH), dtype=jnp.float32)

    # GCNConv params: weight [in, out], bias [out].
    w1 = 0.1 * jax.random.normal(kw1, (IN_CH, HIDDEN_CH), dtype=jnp.float32)
    b1 = 0.1 * jax.random.normal(kb1, (HIDDEN_CH,), dtype=jnp.float32)
    w2 = 0.1 * jax.random.normal(kw2, (HIDDEN_CH, OUT_CH), dtype=jnp.float32)
    b2 = 0.1 * jax.random.normal(kb2, (OUT_CH,), dtype=jnp.float32)

    # Deterministic bidirectional ring graph: edge_index [2, E].
    src = jnp.arange(N, dtype=jnp.int32)
    dst = (src + 1) % N
    edge_index = jnp.stack(
        [jnp.concatenate([src, dst]), jnp.concatenate([dst, src])], axis=0
    )

    fwd = jax.jit(gcn_two_layer)
    out = fwd(x, edge_index, w1, b1, w2, b2)
    out = jax.block_until_ready(out)

    ref = gcn_two_layer_ref(x, edge_index, w1, b1, w2, b2)
    assert out.shape == (N, OUT_CH)
    # bf16 adjacency / RHS (f32 accumulation) -> slightly looser tolerance.
    assert jnp.allclose(out, ref, atol=2e-2, rtol=2e-2), (
        float(jnp.max(jnp.abs(out - ref)))
    )

    print("KERNEL_OK")
</pallas_src>

<mosaic_0001>
module attributes {stable_mosaic.version = 11 : i64} {
  func.func @_gcn_layer2_kernel(%arg0: i32, %arg1: i32, %arg2: memref<1xi32, #tpu.memory_space<smem>>, %arg3: memref<128x128xbf16, #tpu.memory_space<vmem>>, %arg4: memref<128x128xbf16, #tpu.memory_space<vmem>>, %arg5: memref<1x128xf32, #tpu.memory_space<vmem>>, %arg6: memref<128x128xf32, #tpu.memory_space<vmem>>, %arg7: memref<128x128xf32, #tpu.memory_space<vmem>>) attributes {dimension_semantics = [#tpu.dimension_semantics<parallel>, #tpu.dimension_semantics<arbitrary>], iteration_bounds = array<i64: 1, 1>, scalar_prefetch = 1 : i64, scratch_operands = 1 : i64, tpu.core_type = #tpu.core_type<tc>, window_params = [{transform_indices = @transform_0, window_bounds = array<i64: 128, 128>}, {transform_indices = @transform_1, window_bounds = array<i64: 128, 128>}, {pipeline_mode = #tpu.pipeline_mode<synchronous>, transform_indices = @transform_2, window_bounds = array<i64: 1, 128>}, {transform_indices = @transform_3, window_bounds = array<i64: 128, 128>}]} {
    %c0_i32 = arith.constant 0 : i32
    %0 = arith.cmpi eq, %arg1, %c0_i32 : i32
    %1 = arith.extui %0 : i1 to i32
    %c0_i32_0 = arith.constant 0 : i32
    %2 = arith.cmpi ne, %1, %c0_i32_0 : i32
    scf.if %2 {
      %cst = arith.constant 0.000000e+00 : f32
      %13 = vector.broadcast %cst : f32 to vector<128x128xf32>
      %c0 = arith.constant 0 : index
      %c0_5 = arith.constant 0 : index
      %14 = vector.load %arg7[%c0, %c0_5] : memref<128x128xf32, #tpu.memory_space<vmem>>, vector<128x128xf32>
      tpu.vector_store %arg7[%c0, %c0_5], %13 {strides = array<i32>} : memref<128x128xf32, #tpu.memory_space<vmem>>, vector<128x128xf32>,
    } else {
    }
    %c1_i32 = arith.constant 1 : i32
    %3 = arith.muli %arg0, %c1_i32 : i32
    %4 = arith.addi %3, %arg1 : i32
    %5 = arith.index_cast %4 : i32 to index
    %6 = memref.load %arg2[%5] : memref<1xi32, #tpu.memory_space<smem>>
    %c0_i32_1 = arith.constant 0 : i32
    %7 = arith.cmpi ne, %6, %c0_i32_1 : i32
    %8 = arith.extui %7 : i1 to i32
    %c0_i32_2 = arith.constant 0 : i32
    %9 = arith.cmpi ne, %8, %c0_i32_2 : i32
    scf.if %9 {
      %c0 = arith.constant 0 : index
      %c0_5 = arith.constant 0 : index
      %13 = vector.load %arg7[%c0, %c0_5] : memref<128x128xf32, #tpu.memory_space<vmem>>, vector<128x128xf32>
      %c0_6 = arith.constant 0 : index
      %c0_7 = arith.constant 0 : index
      %14 = vector.load %arg3[%c0_6, %c0_7] : memref<128x128xbf16, #tpu.memory_space<vmem>>, vector<128x128xbf16>
      %c0_8 = arith.constant 0 : index
      %c0_9 = arith.constant 0 : index
      %15 = vector.load %arg4[%c0_8, %c0_9] : memref<128x128xbf16, #tpu.memory_space<vmem>>, vector<128x128xbf16>
      %cst = arith.constant dense<0.000000e+00> : vector<128x128xf32>
      %16 = tpu.matmul %14, %15, %cst {dimension_numbers = #tpu.dot_dimension_numbers<[1], [0], [0], [1], [0, 0, 1, 1], [], []>} : vector<128x128xbf16>, vector<128x128xbf16>, vector<128x128xf32> -> vector<128x128xf32>
      %17 = arith.addf %13, %16 : vector<128x128xf32>
      %c0_10 = arith.constant 0 : index
      %c0_11 = arith.constant 0 : index
      %18 = vector.load %arg7[%c0_10, %c0_11] : memref<128x128xf32, #tpu.memory_space<vmem>>, vector<128x128xf32>
      tpu.vector_store %arg7[%c0_10, %c0_11], %17 {strides = array<i32>} : memref<128x128xf32, #tpu.memory_space<vmem>>, vector<128x128xf32>,
    } else {
    }
    %c0_i32_3 = arith.constant 0 : i32
    %10 = arith.cmpi eq, %arg1, %c0_i32_3 : i32
    %11 = arith.extui %10 : i1 to i32
    %c0_i32_4 = arith.constant 0 : i32
    %12 = arith.cmpi ne, %11, %c0_i32_4 : i32
    scf.if %12 {
      %c0 = arith.constant 0 : index
      %c0_5 = arith.constant 0 : index
      %13 = vector.load %arg7[%c0, %c0_5] : memref<128x128xf32, #tpu.memory_space<vmem>>, vector<128x128xf32>
      %c0_6 = arith.constant 0 : index
      %c0_7 = arith.constant 0 : index
      %14 = vector.load %arg5[%c0_6, %c0_7] : memref<1x128xf32, #tpu.memory_space<vmem>>, vector<1x128xf32>
      %15 = vector.broadcast %14 : vector<1x128xf32> to vector<128x128xf32>
      %16 = arith.addf %13, %15 : vector<128x128xf32>
      %c0_8 = arith.constant 0 : index
      %c0_9 = arith.constant 0 : index
      %17 = vector.load %arg6[%c0_8, %c0_9] : memref<128x128xf32, #tpu.memory_space<vmem>>, vector<128x128xf32>
      tpu.vector_store %arg6[%c0_8, %c0_9], %16 {strides = array<i32>} : memref<128x128xf32, #tpu.memory_space<vmem>>, vector<128x128xf32>,
    } else {
    }
    return
  }
  func.func @transform_0(%arg0: i32, %arg1: i32, %arg2: memref<1xi32, #tpu.memory_space<smem>>) -> (i32, i32) {
    %c0_i32 = arith.constant 0 : i32
    return %arg0, %arg1 : i32, i32
  }
  func.func @transform_1(%arg0: i32, %arg1: i32, %arg2: memref<1xi32, #tpu.memory_space<smem>>) -> (i32, i32) {
    %c0_i32 = arith.constant 0 : i32
    %c0_i32_0 = arith.constant 0 : i32
    return %arg1, %c0_i32 : i32, i32
  }
  func.func @transform_2(%arg0: i32, %arg1: i32, %arg2: memref<1xi32, #tpu.memory_space<smem>>) -> (i32, i32) {
    %c0_i32 = arith.constant 0 : i32
    %c0_i32_0 = arith.constant 0 : i32
    %c0_i32_1 = arith.constant 0 : i32
    return %c0_i32, %c0_i32_0 : i32, i32
  }
  func.func @transform_3(%arg0: i32, %arg1: i32, %arg2: memref<1xi32, #tpu.memory_space<smem>>) -> (i32, i32) {
    %c0_i32 = arith.constant 0 : i32
    %c0_i32_0 = arith.constant 0 : i32
    return %arg0, %c0_i32 : i32, i32
  }
}

module attributes {stable_mosaic.version = 11 : i64} {
  func.func @_gcn_layer1_kernel(%arg0: i32, %arg1: i32, %arg2: memref<1xi32, #tpu.memory_space<smem>>, %arg3: memref<128x128xbf16, #tpu.memory_space<vmem>>, %arg4: memref<128x128xbf16, #tpu.memory_space<vmem>>, %arg5: memref<1x128xf32, #tpu.memory_space<vmem>>, %arg6: memref<128x128xf32, #tpu.memory_space<vmem>>, %arg7: memref<128x128xbf16, #tpu.memory_space<vmem>>, %arg8: memref<128x128xf32, #tpu.memory_space<vmem>>) attributes {dimension_semantics = [#tpu.dimension_semantics<parallel>, #tpu.dimension_semantics<arbitrary>], iteration_bounds = array<i64: 1, 1>, scalar_prefetch = 1 : i64, scratch_operands = 1 : i64, tpu.core_type = #tpu.core_type<tc>, window_params = [{transform_indices = @transform_0, window_bounds = array<i64: 128, 128>}, {transform_indices = @transform_1, window_bounds = array<i64: 128, 128>}, {pipeline_mode = #tpu.pipeline_mode<synchronous>, transform_indices = @transform_2, window_bounds = array<i64: 1, 128>}, {pipeline_mode = #tpu.pipeline_mode<synchronous>, transform_indices = @transform_3, window_bounds = array<i64: 128, 128>}, {transform_indices = @transform_4, window_bounds = array<i64: 128, 128>}]} {
    %c0_i32 = arith.constant 0 : i32
    %0 = arith.cmpi eq, %arg1, %c0_i32 : i32
    %1 = arith.extui %0 : i1 to i32
    %c0_i32_0 = arith.constant 0 : i32
    %2 = arith.cmpi ne, %1, %c0_i32_0 : i32
    scf.if %2 {
      %cst = arith.constant 0.000000e+00 : f32
      %13 = vector.broadcast %cst : f32 to vector<128x128xf32>
      %c0 = arith.constant 0 : index
      %c0_5 = arith.constant 0 : index
      %14 = vector.load %arg8[%c0, %c0_5] : memref<128x128xf32, #tpu.memory_space<vmem>>, vector<128x128xf32>
      tpu.vector_store %arg8[%c0, %c0_5], %13 {strides = array<i32>} : memref<128x128xf32, #tpu.memory_space<vmem>>, vector<128x128xf32>,
    } else {
    }
    %c1_i32 = arith.constant 1 : i32
    %3 = arith.muli %arg0, %c1_i32 : i32
    %4 = arith.addi %3, %arg1 : i32
    %5 = arith.index_cast %4 : i32 to index
    %6 = memref.load %arg2[%5] : memref<1xi32, #tpu.memory_space<smem>>
    %c0_i32_1 = arith.constant 0 : i32
    %7 = arith.cmpi ne, %6, %c0_i32_1 : i32
    %8 = arith.extui %7 : i1 to i32
    %c0_i32_2 = arith.constant 0 : i32
    %9 = arith.cmpi ne, %8, %c0_i32_2 : i32
    scf.if %9 {
      %c0 = arith.constant 0 : index
      %c0_5 = arith.constant 0 : index
      %13 = vector.load %arg8[%c0, %c0_5] : memref<128x128xf32, #tpu.memory_space<vmem>>, vector<128x128xf32>
      %c0_6 = arith.constant 0 : index
      %c0_7 = arith.constant 0 : index
      %14 = vector.load %arg3[%c0_6, %c0_7] : memref<128x128xbf16, #tpu.memory_space<vmem>>, vector<128x128xbf16>
      %c0_8 = arith.constant 0 : index
      %c0_9 = arith.constant 0 : index
      %15 = vector.load %arg4[%c0_8, %c0_9] : memref<128x128xbf16, #tpu.memory_space<vmem>>, vector<128x128xbf16>
      %cst = arith.constant dense<0.000000e+00> : vector<128x128xf32>
      %16 = tpu.matmul %14, %15, %cst {dimension_numbers = #tpu.dot_dimension_numbers<[1], [0], [0], [1], [0, 0, 1, 1], [], []>} : vector<128x128xbf16>, vector<128x128xbf16>, vector<128x128xf32> -> vector<128x128xf32>
      %17 = arith.addf %13, %16 : vector<128x128xf32>
      %c0_10 = arith.constant 0 : index
      %c0_11 = arith.constant 0 : index
      %18 = vector.load %arg8[%c0_10, %c0_11] : memref<128x128xf32, #tpu.memory_space<vmem>>, vector<128x128xf32>
      tpu.vector_store %arg8[%c0_10, %c0_11], %17 {strides = array<i32>} : memref<128x128xf32, #tpu.memory_space<vmem>>, vector<128x128xf32>,
    } else {
    }
    %c0_i32_3 = arith.constant 0 : i32
    %10 = arith.cmpi eq, %arg1, %c0_i32_3 : i32
    %11 = arith.extui %10 : i1 to i32
    %c0_i32_4 = arith.constant 0 : i32
    %12 = arith.cmpi ne, %11, %c0_i32_4 : i32
    scf.if %12 {
      %c0 = arith.constant 0 : index
      %c0_5 = arith.constant 0 : index
      %13 = vector.load %arg8[%c0, %c0_5] : memref<128x128xf32, #tpu.memory_space<vmem>>, vector<128x128xf32>
      %c0_6 = arith.constant 0 : index
      %c0_7 = arith.constant 0 : index
      %14 = vector.load %arg5[%c0_6, %c0_7] : memref<1x128xf32, #tpu.memory_space<vmem>>, vector<1x128xf32>
      %15 = vector.broadcast %14 : vector<1x128xf32> to vector<128x128xf32>
      %16 = arith.addf %13, %15 : vector<128x128xf32>
      %cst = arith.constant 0.000000e+00 : f32
      %17 = vector.broadcast %cst : f32 to vector<128x128xf32>
      %18 = arith.maximumf %16, %17 : vector<128x128xf32>
      %c0_8 = arith.constant 0 : index
      %c0_9 = arith.constant 0 : index
      %19 = vector.load %arg6[%c0_8, %c0_9] : memref<128x128xf32, #tpu.memory_space<vmem>>, vector<128x128xf32>
      %cst_10 = arith.constant dense<0.000000e+00> : vector<128x128xf32>
      %20 = tpu.matmul %18, %19, %cst_10 {dimension_numbers = #tpu.dot_dimension_numbers<[1], [0], [0], [1], [0, 0, 1, 1], [], []>} : vector<128x128xf32>, vector<128x128xf32>, vector<128x128xf32> -> vector<128x128xf32>
      %21 = arith.truncf %20 : vector<128x128xf32> to vector<128x128xbf16>
      %c0_11 = arith.constant 0 : index
      %c0_12 = arith.constant 0 : index
      %22 = vector.load %arg7[%c0_11, %c0_12] : memref<128x128xbf16, #tpu.memory_space<vmem>>, vector<128x128xbf16>
      tpu.vector_store %arg7[%c0_11, %c0_12], %21 {strides = array<i32>} : memref<128x128xbf16, #tpu.memory_space<vmem>>, vector<128x128xbf16>,
    } else {
    }
    return
  }
  func.func @transform_0(%arg0: i32, %arg1: i32, %arg2: memref<1xi32, #tpu.memory_space<smem>>) -> (i32, i32) {
    %c0_i32 = arith.constant 0 : i32
    return %arg0, %arg1 : i32, i32
  }
  func.func @transform_1(%arg0: i32, %arg1: i32, %arg2: memref<1xi32, #tpu.memory_space<smem>>) -> (i32, i32) {
    %c0_i32 = arith.constant 0 : i32
    %c0_i32_0 = arith.constant 0 : i32
    return %arg1, %c0_i32 : i32, i32
  }
  func.func @transform_2(%arg0: i32, %arg1: i32, %arg2: memref<1xi32, #tpu.memory_space<smem>>) -> (i32, i32) {
    %c0_i32 = arith.constant 0 : i32
    %c0_i32_0 = arith.constant 0 : i32
    %c0_i32_1 = arith.constant 0 : i32
    return %c0_i32, %c0_i32_0 : i32, i32
  }
  func.func @transform_3(%arg0: i32, %arg1: i32, %arg2: memref<1xi32, #tpu.memory_space<smem>>) -> (i32, i32) {
    %c0_i32 = arith.constant 0 : i32
    %c0_i32_0 = arith.constant 0 : i32
    %c0_i32_1 = arith.constant 0 : i32
    return %c0_i32, %c0_i32_0 : i32, i32
  }
  func.func @transform_4(%arg0: i32, %arg1: i32, %arg2: memref<1xi32, #tpu.memory_space<smem>>) -> (i32, i32) {
    %c0_i32 = arith.constant 0 : i32
    %c0_i32_0 = arith.constant 0 : i32
    return %arg0, %c0_i32 : i32, i32
  }
}

</mosaic_0001>

<bundles_post_ra>
// kernel: gcn_two_layer.3
= control target key start
LH: loop header
LB: loop body
LE: loop exit
PB: predicated region body
PF: predicated region fallthrough
CT: control target
= control target key end

     0   :  { %v477_v0 = vmov 0.0   ;;  %s605_s0 = inlined_call_operand.<no memory space> [shape: s32[1], index: 0, kind: input, shape index: {}]   ;;  %s606_s1 = inlined_call_operand.vmem [shape: bf16[128,128], index: 1, kind: input, shape index: {}]   ;;  %s607_s2 = inlined_call_operand.vmem [shape: bf16[128,128], index: 2, kind: input, shape index: {}]   ;;  %s608_s3 = inlined_call_operand.vmem [shape: f32[1,128], index: 3, kind: input, shape index: {}]   ;;  %s609_s4 = inlined_call_operand.vmem [shape: f32[128,128], index: 4, kind: output, shape index: {}]  }
   0x1   :  { %21 = vst [vmem:[#allocation2 + $0x30] sm:$0xff] %v477_v0  ;;  %22 = vst [vmem:[#allocation2] sm:$0xff] %v477_v0  ;;  %p378_p0 = scmp.eq.s32.totalorder %s605_s0, 0 }
   0x2   :  { %23 = vst [vmem:[#allocation2 + $0x58] sm:$0xff] %v477_v0  ;;  %24 = vst [vmem:[#allocation2 + $0x18] sm:$0xff] %v477_v0 }
   0x3   :  { %25 = vst [vmem:[#allocation2 + $0x50] sm:$0xff] %v477_v0  ;;  %26 = vst [vmem:[#allocation2 + $0x68] sm:$0xff] %v477_v0 }
   0x4   :  { %27 = vst [vmem:[#allocation2 + $0x8] sm:$0xff] %v477_v0  ;;  %28 = vst [vmem:[#allocation2 + $0x48] sm:$0xff] %v477_v0  ;;  %42 = sbr.rel (%p378_p0) target bundleno = 252 (0xfc), region = 21 }
   0x5   :  { %29 = vst [vmem:[#allocation2 + $0x40] sm:$0xff] %v477_v0  ;;  %30 = vst [vmem:[#allocation2 + $0x20] sm:$0xff] %v477_v0 }
   0x6   :  { %31 = vst [vmem:[#allocation2 + $0x10] sm:$0xff] %v477_v0  ;;  %32 = vst [vmem:[#allocation2 + $0x38] sm:$0xff] %v477_v0 }
   0x7   :  { %33 = vst [vmem:[#allocation2 + $0x60] sm:$0xff] %v477_v0  ;;  %34 = vst [vmem:[#allocation2 + $0x70] sm:$0xff] %v477_v0 }
   0x8   :  { %35 = vst [vmem:[#allocation2 + $0x78] sm:$0xff] %v477_v0  ;;  %36 = vst [vmem:[#allocation2 + $0x28] sm:$0xff] %v477_v0 }
   0x9   :  { %v461_v1 = vld [vmem:[%s607_s2 + $0x38] sm:$0xff]   ;;  %v462_v2 = vld [vmem:[%s607_s2 + $0x30] sm:$0xff]   ;;  %v463_v3 = vld [vmem:[%s607_s2 + $0x28] sm:$0xff]  }
   0xa   :  { %412 = vmatprep.subr.bf16.mxu0 %v461_v1  ;;  %444 = vmatprep.subr.bf16.mxu1 %v461_v1  ;;  %v464_v4 = vld [vmem:[%s607_s2 + $0x20] sm:$0xff]   ;;  %v465_v7 = vld [vmem:[%s607_s2 + $0x18] sm:$0xff]   ;;  %v466_v8 = vld [vmem:[%s607_s2 + $0x10] sm:$0xff]  }
   0xb   :  { %413 = vmatpush3.bf16.msra.mxu0 %v461_v1  ;;  %452 = vmatpush3.bf16.msra.mxu1 %v461_v1  ;;  %v469_v5 = vld [vmem:[%s606_s1] sm:$0xff]   ;;  %v467_v9 = vld [vmem:[%s607_s2 + $0x8] sm:$0xff]   ;;  %v473_v13 = vld [vmem:[%s606_s1 + $0x10] sm:$0xff]  }
   0xc   :  { %414 = vmatprep.subr.bf16.mxu0 %v462_v2  ;;  %445 = vmatprep.subr.bf16.mxu1 %v462_v2  ;;  %v470_v6 = vld [vmem:[%s606_s1 + $0x20] sm:$0xff]   ;;  %v471_v11 = vld [vmem:[%s606_s1 + $0x8] sm:$0xff]   ;;  %v474_v14 = vld [vmem:[%s606_s1 + $0x30] sm:$0xff]  }
   0xd   :  { %428 = vmatprep.mubr.bf16.mxu0 %v469_v5  ;;  %436 = vmatprep.mubr.bf16.mxu1 %v470_v6  ;;  %v468_v10 = vld [vmem:[%s607_s2] sm:$0xff]   ;;  %v472_v12 = vld [vmem:[%s606_s1 + $0x28] sm:$0xff]   ;;  %v475_v15 = vld [vmem:[%s606_s1 + $0x18] sm:$0xff]  }
   0xe   :  { %v476_v16 = vld [vmem:[%s606_s1 + $0x38] sm:$0xff]   ;;  %v53_v18 = vld [vmem:[#allocation2 + $0x10] sm:$0xff]  ;;  %v51_v22 = vld [vmem:[#allocation2 + $0x40] sm:$0xff] }
   0xf   :  { %415 = vmatpush3.bf16.msra.mxu0 %v462_v2  ;;  %453 = vmatpush3.bf16.msra.mxu1 %v462_v2  ;;  %v45_v17 = vld [vmem:[#allocation2 + $0x58] sm:$0xff]  ;;  %v43_v21 = vld [vmem:[#allocation2 + $0x30] sm:$0xff]  ;;  %v44_v33 = vld [vmem:[#allocation2] sm:$0xff] }
  0x10   :  { %416 = vmatprep.subr.bf16.mxu0 %v463_v3  ;;  %446 = vmatprep.subr.bf16.mxu1 %v463_v3  ;;  %v46_v27 = vld [vmem:[#allocation2 + $0x18] sm:$0xff]  ;;  %v52_v34 = vld [vmem:[#allocation2 + $0x20] sm:$0xff]  ;;  %v49_v39 = vld [vmem:[#allocation2 + $0x8] sm:$0xff] }
  0x11   :  { %v54_v28 = vld [vmem:[#allocation2 + $0x38] sm:$0xff]  ;;  %v47_v45 = vld [vmem:[#allocation2 + $0x50] sm:$0xff]  ;;  %v55_v46 = vld [vmem:[#allocation2 + $0x60] sm:$0xff] }
  0x12   :  { %v57_v40 = vld [vmem:[#allocation2 + $0x78] sm:$0xff]  ;;  %v50_v51 = vld [vmem:[#allocation2 + $0x48] sm:$0xff]  ;;  %v56_v58 = vld [vmem:[#allocation2 + $0x70] sm:$0xff] }
  0x13   :  { %417 = vmatpush3.bf16.msra.mxu0 %v463_v3  ;;  %454 = vmatpush3.bf16.msra.mxu1 %v463_v3  ;;  %v58_v52 = vld [vmem:[#allocation2 + $0x28] sm:$0xff] }
  0x14   :  { %418 = vmatprep.subr.bf16.mxu0 %v464_v4  ;;  %447 = vmatprep.subr.bf16.mxu1 %v464_v4  ;;  %v48_v57 = vld [vmem:[#allocation2 + $0x68] sm:$0xff] }
  0x17   :  { %419 = vmatpush3.bf16.msra.mxu0 %v464_v4  ;;  %455 = vmatpush3.bf16.msra.mxu1 %v464_v4 }
  0x18   :  { %420 = vmatprep.subr.bf16.mxu0 %v465_v7  ;;  %448 = vmatprep.subr.bf16.mxu1 %v465_v7 }
  0x1b   :  { %421 = vmatpush3.bf16.msra.mxu0 %v465_v7  ;;  %456 = vmatpush3.bf16.msra.mxu1 %v465_v7 }
  0x1c   :  { %422 = vmatprep.subr.bf16.mxu0 %v466_v8  ;;  %449 = vmatprep.subr.bf16.mxu1 %v466_v8 }
  0x1f   :  { %423 = vmatpush3.bf16.msra.mxu0 %v466_v8  ;;  %457 = vmatpush3.bf16.msra.mxu1 %v466_v8 }
  0x20   :  { %424 = vmatprep.subr.bf16.mxu0 %v467_v9  ;;  %450 = vmatprep.subr.bf16.mxu1 %v467_v9 }
  0x23   :  { %425 = vmatpush3.bf16.msra.mxu0 %v467_v9  ;;  %458 = vmatpush3.bf16.msra.mxu1 %v467_v9 }
  0x24   :  { %426 = vmatprep.subr.bf16.mxu0 %v468_v10  ;;  %451 = vmatprep.subr.bf16.mxu1 %v468_v10 }
  0x27   :  { %427 = vmatpush3.bf16.msra.mxu0 %v468_v10  ;;  %459 = vmatpush3.bf16.msra.mxu1 %v468_v10 }
  0x2a   :  { %429 = vmatmul.mubr.bf16.vlgmr.msra.gmra.mxu0 %v471_v11  ;;  %437 = vmatmul.mubr.bf16.vlgmr.msra.gmra.mxu1 %v472_v12 }
  0x2b   :  { %432 = vmatprep.mubr.bf16.mxu0 %v473_v13  ;;  %440 = vmatprep.mubr.bf16.mxu1 %v474_v14 }
  0x32   :  { %433 = vmatmul.mubr.bf16.gmra.mxu0 %v475_v15  ;;  %441 = vmatmul.mubr.bf16.gmra.mxu1 %v476_v16 }
  0xea   :  { %v430_v19 = vpop.f32.mrf.mxu0  ;;  %v438_v20 = vpop.f32.mrf.mxu1 }
  0xeb   :  { %v286_v23 = vadd.f32 %v430_v19, %v45_v17  ;;  %v294_v24 = vadd.f32 %v438_v20, %v53_v18 }
  0xec   :  { %v221_v25 = vpop.f32.mrf.mxu0  ;;  %v253_v26 = vpop.f32.mrf.mxu1 }
  0xed   :  { %302 = vst [vmem:[#allocation2 + $0x58] sm:$0xff] %v286_v23  ;;  %310 = vst [vmem:[#allocation2 + $0x10] sm:$0xff] %v294_v24  ;;  %v284_v29 = vadd.f32 %v221_v25, %v43_v21  ;;  %v292_v30 = vadd.f32 %v253_v26, %v51_v22 }
  0xee   :  { %v431_v31 = vpop.f32.mrf.mxu0  ;;  %v439_v32 = vpop.f32.mrf.mxu1 }
  0xef   :  { %300 = vst [vmem:[#allocation2 + $0x30] sm:$0xff] %v284_v29  ;;  %308 = vst [vmem:[#allocation2 + $0x40] sm:$0xff] %v292_v30  ;;  %v287_v35 = vadd.f32 %v431_v31, %v46_v27  ;;  %v295_v36 = vadd.f32 %v439_v32, %v54_v28 }
  0xf0   :  { %v224_v37 = vpop.f32.mrf.mxu0  ;;  %v256_v38 = vpop.f32.mrf.mxu1 }
  0xf1   :  { %303 = vst [vmem:[#allocation2 + $0x18] sm:$0xff] %v287_v35  ;;  %311 = vst [vmem:[#allocation2 + $0x38] sm:$0xff] %v295_v36  ;;  %v285_v41 = vadd.f32 %v224_v37, %v44_v33  ;;  %v293_v42 = vadd.f32 %v256_v38, %v52_v34 }
  0xf2   :  { %v434_v43 = vpop.f32.mrf.mxu0  ;;  %v442_v44 = vpop.f32.mrf.mxu1 }
  0xf3   :  { %301 = vst [vmem:[#allocation2] sm:$0xff] %v285_v41  ;;  %309 = vst [vmem:[#allocation2 + $0x20] sm:$0xff] %v293_v42  ;;  %v290_v47 = vadd.f32 %v434_v43, %v49_v39  ;;  %v298_v48 = vadd.f32 %v442_v44, %v57_v40 }
  0xf4   :  { %v237_v49 = vpop.f32.mrf.mxu0  ;;  %v269_v50 = vpop.f32.mrf.mxu1 }
  0xf5   :  { %306 = vst [vmem:[#allocation2 + $0x8] sm:$0xff] %v290_v47  ;;  %314 = vst [vmem:[#allocation2 + $0x78] sm:$0xff] %v298_v48  ;;  %v288_v53 = vadd.f32 %v237_v49, %v47_v45  ;;  %v296_v54 = vadd.f32 %v269_v50, %v55_v46 }
  0xf6   :  { %v435_v55 = vpop.f32.mrf.mxu0  ;;  %v443_v56 = vpop.f32.mrf.mxu1 }
  0xf7   :  { %304 = vst [vmem:[#allocation2 + $0x50] sm:$0xff] %v288_v53  ;;  %312 = vst [vmem:[#allocation2 + $0x60] sm:$0xff] %v296_v54  ;;  %v291_v59 = vadd.f32 %v435_v55, %v50_v51  ;;  %v299_v60 = vadd.f32 %v443_v56, %v58_v52 }
  0xf8   :  { %v240_v61 = vpop.f32.mrf.mxu0  ;;  %v272_v62 = vpop.f32.mrf.mxu1 }
  0xf9   :  { %307 = vst [vmem:[#allocation2 + $0x48] sm:$0xff] %v291_v59  ;;  %315 = vst [vmem:[#allocation2 + $0x28] sm:$0xff] %v299_v60  ;;  %v289_v63 = vadd.f32 %v240_v61, %v48_v57  ;;  %v297_v0 = vadd.f32 %v272_v62, %v56_v58 }
  0xfb   :  { %305 = vst [vmem:[#allocation2 + $0x68] sm:$0xff] %v289_v63  ;;  %313 = vst [vmem:[#allocation2 + $0x70] sm:$0xff] %v297_v0 }
  0xfc PF:  { %v319_v1 = vld [vmem:[#allocation2 + $0x30] sm:$0xff]  ;;  %v395_v2 = vld [vmem:[%s608_s3] ss:$0 sm:$0xff]  ;;  %v321_v6 = vld [vmem:[#allocation2 + $0x58] sm:$0xff] }
  0xfd   :  { %v320_v3 = vld [vmem:[#allocation2] sm:$0xff]  ;;  %v342_v4 = vadd.f32 %v395_v2, %v319_v1  ;;  %v322_v7 = vld [vmem:[#allocation2 + $0x18] sm:$0xff]  ;;  %v344_v9 = vadd.f32 %v395_v2, %v321_v6 }
  0xfe   :  { %v343_v5 = vadd.f32 %v395_v2, %v320_v3  ;;  %v323_v8 = vld [vmem:[#allocation2 + $0x50] sm:$0xff]  ;;  %v345_v10 = vadd.f32 %v395_v2, %v322_v7  ;;  %v325_v13 = vld [vmem:[#allocation2 + $0x8] sm:$0xff] }
  0xff   :  { %v346_v11 = vadd.f32 %v395_v2, %v323_v8  ;;  %358 = vst [vmem:[%s609_s4] sm:$0xff] %v342_v4  ;;  %v348_v16 = vadd.f32 %v395_v2, %v325_v13  ;;  %v327_v18 = vld [vmem:[#allocation2 + $0x40] sm:$0xff]  ;;  %360 = vst [vmem:[%s609_s4 + $0x10] sm:$0xff] %v344_v9 }
 0x100   :  { %v326_v14 = vld [vmem:[#allocation2 + $0x48] sm:$0xff]  ;;  %359 = vst [vmem:[%s609_s4 + $0x8] sm:$0xff] %v343_v5  ;;  %v328_v19 = vld [vmem:[#allocation2 + $0x20] sm:$0xff]  ;;  %v329_v20 = vld [vmem:[#allocation2 + $0x10] sm:$0xff]  ;;  %v350_v21 = vadd.f32 %v395_v2, %v327_v18 }
 0x101   :  { %v349_v17 = vadd.f32 %v395_v2, %v326_v14  ;;  %361 = vst [vmem:[%s609_s4 + $0x18] sm:$0xff] %v345_v10  ;;  %362 = vst [vmem:[%s609_s4 + $0x20] sm:$0xff] %v346_v11  ;;  %v351_v22 = vadd.f32 %v395_v2, %v328_v19  ;;  %v352_v23 = vadd.f32 %v395_v2, %v329_v20  ;;  %v330_v24 = vld [vmem:[#allocation2 + $0x38] sm:$0xff]  ;;  %v331_v25 = vld [vmem:[#allocation2 + $0x60] sm:$0xff] }
 0x102   :  { %v324_v12 = vld [vmem:[#allocation2 + $0x68] sm:$0xff]  ;;  %v332_v26 = vld [vmem:[#allocation2 + $0x70] sm:$0xff]  ;;  %364 = vst [vmem:[%s609_s4 + $0x30] sm:$0xff] %v348_v16  ;;  %v353_v27 = vadd.f32 %v395_v2, %v330_v24  ;;  %v354_v28 = vadd.f32 %v395_v2, %v331_v25  ;;  %v333_v30 = vld [vmem:[#allocation2 + $0x78] sm:$0xff] }
 0x103   :  { %v347_v15 = vadd.f32 %v395_v2, %v324_v12  ;;  %365 = vst [vmem:[%s609_s4 + $0x38] sm:$0xff] %v349_v17  ;;  %v355_v29 = vadd.f32 %v395_v2, %v332_v26  ;;  %v334_v31 = vld [vmem:[#allocation2 + $0x28] sm:$0xff]  ;;  %366 = vst [vmem:[%s609_s4 + $0x40] sm:$0xff] %v350_v21  ;;  %v356_v32 = vadd.f32 %v395_v2, %v333_v30 }
 0x104   :  { %367 = vst [vmem:[%s609_s4 + $0x48] sm:$0xff] %v351_v22  ;;  %368 = vst [vmem:[%s609_s4 + $0x50] sm:$0xff] %v352_v23  ;;  %v357_v33 = vadd.f32 %v395_v2, %v334_v31 }
 0x105   :  { %363 = vst [vmem:[%s609_s4 + $0x28] sm:$0xff] %v347_v15  ;;  %369 = vst [vmem:[%s609_s4 + $0x58] sm:$0xff] %v353_v27 }
 0x106   :  { %370 = vst [vmem:[%s609_s4 + $0x60] sm:$0xff] %v354_v28  ;;  %371 = vst [vmem:[%s609_s4 + $0x68] sm:$0xff] %v355_v29 }
 0x107   :  { %372 = vst [vmem:[%s609_s4 + $0x70] sm:$0xff] %v356_v32  ;;  %373 = vst [vmem:[%s609_s4 + $0x78] sm:$0xff] %v357_v33 }

// kernel: gcn_two_layer.2
= control target key start
LH: loop header
LB: loop body
LE: loop exit
PB: predicated region body
PF: predicated region fallthrough
CT: control target
= control target key end

     0   :  { %v920_v0 = vmov 0.0   ;;  %s1095_s0 = inlined_call_operand.<no memory space> [shape: s32[1], index: 0, kind: input, shape index: {}]   ;;  %s1096_s1 = inlined_call_operand.vmem [shape: bf16[128,128], index: 1, kind: input, shape index: {}]   ;;  %s1097_s2 = inlined_call_operand.vmem [shape: bf16[128,128], index: 2, kind: input, shape index: {}]   ;;  %s1098_s3 = inlined_call_operand.vmem [shape: f32[1,128], index: 3, kind: input, shape index: {}]   ;;  %s1099_s4 = inlined_call_operand.vmem [shape: f32[128,128], index: 4, kind: input, shape index: {}]   ;;  %s1100_s5 = inlined_call_operand.vmem [shape: bf16[128,128], index: 5, kind: output, shape index: {}]  }
   0x1   :  { %24 = vst [vmem:[#allocation2 + $0x30] sm:$0xff] %v920_v0  ;;  %25 = vst [vmem:[#allocation2] sm:$0xff] %v920_v0  ;;  %p622_p0 = scmp.eq.s32.totalorder %s1095_s0, 0 }
   0x2   :  { %26 = vst [vmem:[#allocation2 + $0x58] sm:$0xff] %v920_v0  ;;  %27 = vst [vmem:[#allocation2 + $0x18] sm:$0xff] %v920_v0 }
   0x3   :  { %28 = vst [vmem:[#allocation2 + $0x50] sm:$0xff] %v920_v0  ;;  %29 = vst [vmem:[#allocation2 + $0x68] sm:$0xff] %v920_v0 }
   0x4   :  { %30 = vst [vmem:[#allocation2 + $0x8] sm:$0xff] %v920_v0  ;;  %31 = vst [vmem:[#allocation2 + $0x48] sm:$0xff] %v920_v0  ;;  %45 = sbr.rel (%p622_p0) target bundleno = 252 (0xfc), region = 25 }
   0x5   :  { %32 = vst [vmem:[#allocation2 + $0x40] sm:$0xff] %v920_v0  ;;  %33 = vst [vmem:[#allocation2 + $0x20] sm:$0xff] %v920_v0 }
   0x6   :  { %34 = vst [vmem:[#allocation2 + $0x10] sm:$0xff] %v920_v0  ;;  %35 = vst [vmem:[#allocation2 + $0x38] sm:$0xff] %v920_v0 }
   0x7   :  { %36 = vst [vmem:[#allocation2 + $0x60] sm:$0xff] %v920_v0  ;;  %37 = vst [vmem:[#allocation2 + $0x70] sm:$0xff] %v920_v0 }
   0x8   :  { %38 = vst [vmem:[#allocation2 + $0x78] sm:$0xff] %v920_v0  ;;  %39 = vst [vmem:[#allocation2 + $0x28] sm:$0xff] %v920_v0 }
   0x9   :  { %v904_v1 = vld [vmem:[%s1097_s2 + $0x38] sm:$0xff]   ;;  %v905_v2 = vld [vmem:[%s1097_s2 + $0x30] sm:$0xff]   ;;  %v906_v3 = vld [vmem:[%s1097_s2 + $0x28] sm:$0xff]  }
   0xa   :  { %767 = vmatprep.subr.bf16.mxu0 %v904_v1  ;;  %855 = vmatprep.subr.bf16.mxu1 %v904_v1  ;;  %v907_v4 = vld [vmem:[%s1097_s2 + $0x20] sm:$0xff]   ;;  %v908_v7 = vld [vmem:[%s1097_s2 + $0x18] sm:$0xff]   ;;  %v909_v8 = vld [vmem:[%s1097_s2 + $0x10] sm:$0xff]  }
   0xb   :  { %768 = vmatpush3.bf16.msra.mxu0 %v904_v1  ;;  %863 = vmatpush3.bf16.msra.mxu1 %v904_v1  ;;  %v912_v5 = vld [vmem:[%s1096_s1] sm:$0xff]   ;;  %v910_v9 = vld [vmem:[%s1097_s2 + $0x8] sm:$0xff]   ;;  %v916_v13 = vld [vmem:[%s1096_s1 + $0x10] sm:$0xff]  }
   0xc   :  { %769 = vmatprep.subr.bf16.mxu0 %v905_v2  ;;  %856 = vmatprep.subr.bf16.mxu1 %v905_v2  ;;  %v913_v6 = vld [vmem:[%s1096_s1 + $0x20] sm:$0xff]   ;;  %v914_v11 = vld [vmem:[%s1096_s1 + $0x8] sm:$0xff]   ;;  %v917_v14 = vld [vmem:[%s1096_s1 + $0x30] sm:$0xff]  }
   0xd   :  { %783 = vmatprep.mubr.bf16.mxu0 %v912_v5  ;;  %791 = vmatprep.mubr.bf16.mxu1 %v913_v6  ;;  %v911_v10 = vld [vmem:[%s1097_s2] sm:$0xff]   ;;  %v915_v12 = vld [vmem:[%s1096_s1 + $0x28] sm:$0xff]   ;;  %v918_v15 = vld [vmem:[%s1096_s1 + $0x18] sm:$0xff]  }
   0xe   :  { %v919_v16 = vld [vmem:[%s1096_s1 + $0x38] sm:$0xff]   ;;  %v56_v18 = vld [vmem:[#allocation2 + $0x10] sm:$0xff]  ;;  %v54_v22 = vld [vmem:[#allocation2 + $0x40] sm:$0xff] }
   0xf   :  { %770 = vmatpush3.bf16.msra.mxu0 %v905_v2  ;;  %864 = vmatpush3.bf16.msra.mxu1 %v905_v2  ;;  %v48_v17 = vld [vmem:[#allocation2 + $0x58] sm:$0xff]  ;;  %v46_v21 = vld [vmem:[#allocation2 + $0x30] sm:$0xff]  ;;  %v47_v33 = vld [vmem:[#allocation2] sm:$0xff] }
  0x10   :  { %771 = vmatprep.subr.bf16.mxu0 %v906_v3  ;;  %857 = vmatprep.subr.bf16.mxu1 %v906_v3  ;;  %v49_v27 = vld [vmem:[#allocation2 + $0x18] sm:$0xff]  ;;  %v55_v34 = vld [vmem:[#allocation2 + $0x20] sm:$0xff]  ;;  %v52_v39 = vld [vmem:[#allocation2 + $0x8] sm:$0xff] }
  0x11   :  { %v57_v28 = vld [vmem:[#allocation2 + $0x38] sm:$0xff]  ;;  %v50_v45 = vld [vmem:[#allocation2 + $0x50] sm:$0xff]  ;;  %v58_v46 = vld [vmem:[#allocation2 + $0x60] sm:$0xff] }
  0x12   :  { %v60_v40 = vld [vmem:[#allocation2 + $0x78] sm:$0xff]  ;;  %v53_v51 = vld [vmem:[#allocation2 + $0x48] sm:$0xff]  ;;  %v59_v58 = vld [vmem:[#allocation2 + $0x70] sm:$0xff] }
  0x13   :  { %772 = vmatpush3.bf16.msra.mxu0 %v906_v3  ;;  %865 = vmatpush3.bf16.msra.mxu1 %v906_v3  ;;  %v61_v52 = vld [vmem:[#allocation2 + $0x28] sm:$0xff] }
  0x14   :  { %773 = vmatprep.subr.bf16.mxu0 %v907_v4  ;;  %858 = vmatprep.subr.bf16.mxu1 %v907_v4  ;;  %v51_v57 = vld [vmem:[#allocation2 + $0x68] sm:$0xff] }
  0x17   :  { %774 = vmatpush3.bf16.msra.mxu0 %v907_v4  ;;  %866 = vmatpush3.bf16.msra.mxu1 %v907_v4 }
  0x18   :  { %775 = vmatprep.subr.bf16.mxu0 %v908_v7  ;;  %859 = vmatprep.subr.bf16.mxu1 %v908_v7 }
  0x1b   :  { %776 = vmatpush3.bf16.msra.mxu0 %v908_v7  ;;  %867 = vmatpush3.bf16.msra.mxu1 %v908_v7 }
  0x1c   :  { %777 = vmatprep.subr.bf16.mxu0 %v909_v8  ;;  %860 = vmatprep.subr.bf16.mxu1 %v909_v8 }
  0x1f   :  { %778 = vmatpush3.bf16.msra.mxu0 %v909_v8  ;;  %868 = vmatpush3.bf16.msra.mxu1 %v909_v8 }
  0x20   :  { %779 = vmatprep.subr.bf16.mxu0 %v910_v9  ;;  %861 = vmatprep.subr.bf16.mxu1 %v910_v9 }
  0x23   :  { %780 = vmatpush3.bf16.msra.mxu0 %v910_v9  ;;  %869 = vmatpush3.bf16.msra.mxu1 %v910_v9 }
  0x24   :  { %781 = vmatprep.subr.bf16.mxu0 %v911_v10  ;;  %862 = vmatprep.subr.bf16.mxu1 %v911_v10 }
  0x27   :  { %782 = vmatpush3.bf16.msra.mxu0 %v911_v10  ;;  %870 = vmatpush3.bf16.msra.mxu1 %v911_v10 }
  0x2a   :  { %784 = vmatmul.mubr.bf16.vlgmr.msra.gmra.mxu0 %v914_v11  ;;  %792 = vmatmul.mubr.bf16.vlgmr.msra.gmra.mxu1 %v915_v12 }
  0x2b   :  { %787 = vmatprep.mubr.bf16.mxu0 %v916_v13  ;;  %795 = vmatprep.mubr.bf16.mxu1 %v917_v14 }
  0x32   :  { %788 = vmatmul.mubr.bf16.gmra.mxu0 %v918_v15  ;;  %796 = vmatmul.mubr.bf16.gmra.mxu1 %v919_v16 }
  0xea   :  { %v785_v19 = vpop.f32.mrf.mxu0  ;;  %v793_v20 = vpop.f32.mrf.mxu1 }
  0xeb   :  { %v289_v23 = vadd.f32 %v785_v19, %v48_v17  ;;  %v297_v24 = vadd.f32 %v793_v20, %v56_v18 }
  0xec   :  { %v224_v25 = vpop.f32.mrf.mxu0  ;;  %v256_v26 = vpop.f32.mrf.mxu1 }
  0xed   :  { %305 = vst [vmem:[#allocation2 + $0x58] sm:$0xff] %v289_v23  ;;  %313 = vst [vmem:[#allocation2 + $0x10] sm:$0xff] %v297_v24  ;;  %v287_v29 = vadd.f32 %v224_v25, %v46_v21  ;;  %v295_v30 = vadd.f32 %v256_v26, %v54_v22 }
  0xee   :  { %v786_v31 = vpop.f32.mrf.mxu0  ;;  %v794_v32 = vpop.f32.mrf.mxu1 }
  0xef   :  { %303 = vst [vmem:[#allocation2 + $0x30] sm:$0xff] %v287_v29  ;;  %311 = vst [vmem:[#allocation2 + $0x40] sm:$0xff] %v295_v30  ;;  %v290_v35 = vadd.f32 %v786_v31, %v49_v27  ;;  %v298_v36 = vadd.f32 %v794_v32, %v57_v28 }
  0xf0   :  { %v227_v37 = vpop.f32.mrf.mxu0  ;;  %v259_v38 = vpop.f32.mrf.mxu1 }
  0xf1   :  { %306 = vst [vmem:[#allocation2 + $0x18] sm:$0xff] %v290_v35  ;;  %314 = vst [vmem:[#allocation2 + $0x38] sm:$0xff] %v298_v36  ;;  %v288_v41 = vadd.f32 %v227_v37, %v47_v33  ;;  %v296_v42 = vadd.f32 %v259_v38, %v55_v34 }
  0xf2   :  { %v789_v43 = vpop.f32.mrf.mxu0  ;;  %v797_v44 = vpop.f32.mrf.mxu1 }
  0xf3   :  { %304 = vst [vmem:[#allocation2] sm:$0xff] %v288_v41  ;;  %312 = vst [vmem:[#allocation2 + $0x20] sm:$0xff] %v296_v42  ;;  %v293_v47 = vadd.f32 %v789_v43, %v52_v39  ;;  %v301_v48 = vadd.f32 %v797_v44, %v60_v40 }
  0xf4   :  { %v240_v49 = vpop.f32.mrf.mxu0  ;;  %v272_v50 = vpop.f32.mrf.mxu1 }
  0xf5   :  { %309 = vst [vmem:[#allocation2 + $0x8] sm:$0xff] %v293_v47  ;;  %317 = vst [vmem:[#allocation2 + $0x78] sm:$0xff] %v301_v48  ;;  %v291_v53 = vadd.f32 %v240_v49, %v50_v45  ;;  %v299_v54 = vadd.f32 %v272_v50, %v58_v46 }
  0xf6   :  { %v790_v55 = vpop.f32.mrf.mxu0  ;;  %v798_v56 = vpop.f32.mrf.mxu1 }
  0xf7   :  { %307 = vst [vmem:[#allocation2 + $0x50] sm:$0xff] %v291_v53  ;;  %315 = vst [vmem:[#allocation2 + $0x60] sm:$0xff] %v299_v54  ;;  %v294_v59 = vadd.f32 %v790_v55, %v53_v51  ;;  %v302_v60 = vadd.f32 %v798_v56, %v61_v52 }
  0xf8   :  { %v243_v61 = vpop.f32.mrf.mxu0  ;;  %v275_v62 = vpop.f32.mrf.mxu1 }
  0xf9   :  { %310 = vst [vmem:[#allocation2 + $0x48] sm:$0xff] %v294_v59  ;;  %318 = vst [vmem:[#allocation2 + $0x28] sm:$0xff] %v302_v60  ;;  %v292_v63 = vadd.f32 %v243_v61, %v51_v57  ;;  %v300_v0 = vadd.f32 %v275_v62, %v59_v58 }
  0xfb   :  { %308 = vst [vmem:[#allocation2 + $0x68] sm:$0xff] %v292_v63  ;;  %316 = vst [vmem:[#allocation2 + $0x70] sm:$0xff] %v300_v0 }
  0xfc PF:  { %v392_v1 = vld [vmem:[%s1099_s4 + $0x78] sm:$0xff]  ;;  %v391_v2 = vld [vmem:[%s1099_s4 + $0x70] sm:$0xff]  ;;  %v390_v3 = vld [vmem:[%s1099_s4 + $0x68] sm:$0xff] }
  0xfd   :  { %799 = vmatprep.subr.mxu0 %v392_v1  ;;  %871 = vmatprep.subr.mxu1 %v392_v1  ;;  %v389_v4 = vld [vmem:[%s1099_s4 + $0x60] sm:$0xff]  ;;  %v388_v5 = vld [vmem:[%s1099_s4 + $0x58] sm:$0xff]  ;;  %v387_v6 = vld [vmem:[%s1099_s4 + $0x50] sm:$0xff] }
  0xfe   :  { %800 = vmatpush3.msra.mxu0 %v392_v1  ;;  %887 = vmatpush3.msra.mxu1 %v392_v1  ;;  %v386_v7 = vld [vmem:[%s1099_s4 + $0x48] sm:$0xff]  ;;  %v385_v8 = vld [vmem:[%s1099_s4 + $0x40] sm:$0xff]  ;;  %v384_v9 = vld [vmem:[%s1099_s4 + $0x38] sm:$0xff] }
  0xff   :  { %801 = vmatprep.subr.mxu0 %v391_v2  ;;  %872 = vmatprep.subr.mxu1 %v391_v2  ;;  %v383_v10 = vld [vmem:[%s1099_s4 + $0x30] sm:$0xff]  ;;  %v382_v11 = vld [vmem:[%s1099_s4 + $0x28] sm:$0xff]  ;;  %v381_v12 = vld [vmem:[%s1099_s4 + $0x20] sm:$0xff] }
 0x100   :  { %802 = vmatpush3.msra.mxu0 %v391_v2  ;;  %888 = vmatpush3.msra.mxu1 %v391_v2  ;;  %v380_v13 = vld [vmem:[%s1099_s4 + $0x18] sm:$0xff]  ;;  %v322_v14 = vld [vmem:[#allocation2 + $0x30] sm:$0xff]  ;;  %v1044_v15 = vld [vmem:[%s1098_s3] ss:$0 sm:$0xff] }
 0x101   :  { %803 = vmatprep.subr.mxu0 %v390_v3  ;;  %873 = vmatprep.subr.mxu1 %v390_v3  ;;  %v330_v16 = vld [vmem:[#allocation2 + $0x40] sm:$0xff]  ;;  %v379_v19 = vld [vmem:[%s1099_s4 + $0x10] sm:$0xff]  ;;  %v324_v20 = vld [vmem:[#allocation2 + $0x58] sm:$0xff]  ;;  %v345_v22 = vadd.f32 %v1044_v15, %v322_v14 }
 0x102   :  { %804 = vmatpush3.msra.mxu0 %v390_v3  ;;  %889 = vmatpush3.msra.mxu1 %v390_v3  ;;  %v323_v17 = vld [vmem:[#allocation2] sm:$0xff]  ;;  %v332_v21 = vld [vmem:[#allocation2 + $0x10] sm:$0xff]  ;;  %v353_v23 = vadd.f32 %v1044_v15, %v330_v16  ;;  %v378_v24 = vld [vmem:[%s1099_s4 + $0x8] sm:$0xff]  ;;  %v347_v27 = vadd.f32 %v1044_v15, %v324_v20 }
 0x103   :  { %805 = vmatprep.subr.mxu0 %v389_v4  ;;  %874 = vmatprep.subr.mxu1 %v389_v4  ;;  %v331_v18 = vld [vmem:[#allocation2 + $0x20] sm:$0xff]  ;;  %v346_v25 = vadd.f32 %v1044_v15, %v323_v17  ;;  %v355_v28 = vadd.f32 %v1044_v15, %v332_v21  ;;  %v325_v29 = vld [vmem:[#allocation2 + $0x18] sm:$0xff]  ;;  %v326_v32 = vld [vmem:[#allocation2 + $0x50] sm:$0xff]  ;;  %v361_v34 = vmax.f32 %v345_v22, 0.0 }
 0x104   :  { %806 = vmatpush3.msra.mxu0 %v389_v4  ;;  %890 = vmatpush3.msra.mxu1 %v389_v4  ;;  %v354_v26 = vadd.f32 %v1044_v15, %v331_v18  ;;  %v333_v30 = vld [vmem:[#allocation2 + $0x38] sm:$0xff]  ;;  %v377_v31 = vld [vmem:[%s1099_s4] sm:$0xff]  ;;  %v369_v35 = vmax.f32 %v353_v23, 0.0  ;;  %v348_v38 = vadd.f32 %v1044_v15, %v325_v29  ;;  %v363_v40 = vmax.f32 %v347_v27, 0.0  ;;  %v327_v44 = vld [vmem:[#allocation2 + $0x68] sm:$0xff] }
 0x105   :  { %807 = vmatprep.subr.mxu0 %v388_v5  ;;  %875 = vmatprep.subr.mxu1 %v388_v5  ;;  %v334_v33 = vld [vmem:[#allocation2 + $0x60] sm:$0xff]  ;;  %v362_v36 = vmax.f32 %v346_v25, 0.0  ;;  %v356_v39 = vadd.f32 %v1044_v15, %v333_v30  ;;  %v371_v41 = vmax.f32 %v355_v28, 0.0  ;;  %v349_v42 = vadd.f32 %v1044_v15, %v326_v32  ;;  %v335_v45 = vld [vmem:[#allocation2 + $0x70] sm:$0xff]  ;;  %v328_v46 = vld [vmem:[#allocation2 + $0x8] sm:$0xff] }
 0x106   :  { %808 = vmatpush3.msra.mxu0 %v388_v5  ;;  %891 = vmatpush3.msra.mxu1 %v388_v5  ;;  %v370_v37 = vmax.f32 %v354_v26, 0.0  ;;  %v357_v43 = vadd.f32 %v1044_v15, %v334_v33  ;;  %v336_v47 = vld [vmem:[#allocation2 + $0x78] sm:$0xff]  ;;  %v364_v48 = vmax.f32 %v348_v38, 0.0  ;;  %v350_v50 = vadd.f32 %v1044_v15, %v327_v44  ;;  %v329_v56 = vld [vmem:[#allocation2 + $0x48] sm:$0xff] }
 0x107   :  { %809 = vmatprep.subr.mxu0 %v387_v6  ;;  %876 = vmatprep.subr.mxu1 %v387_v6  ;;  %v372_v49 = vmax.f32 %v356_v39, 0.0  ;;  %v358_v51 = vadd.f32 %v1044_v15, %v335_v45  ;;  %v365_v52 = vmax.f32 %v349_v42, 0.0  ;;  %v351_v54 = vadd.f32 %v1044_v15, %v328_v46  ;;  %v337_v57 = vld [vmem:[#allocation2 + $0x28] sm:$0xff] }
 0x108   :  { %810 = vmatpush3.msra.mxu0 %v387_v6  ;;  %892 = vmatpush3.msra.mxu1 %v387_v6  ;;  %v373_v53 = vmax.f32 %v357_v43, 0.0  ;;  %v359_v55 = vadd.f32 %v1044_v15, %v336_v47  ;;  %v366_v58 = vmax.f32 %v350_v50, 0.0  ;;  %v352_v60 = vadd.f32 %v1044_v15, %v329_v56 }
 0x109   :  { %811 = vmatprep.subr.mxu0 %v386_v7  ;;  %877 = vmatprep.subr.mxu1 %v386_v7  ;;  %v374_v59 = vmax.f32 %v358_v51, 0.0  ;;  %v360_v61 = vadd.f32 %v1044_v15, %v337_v57  ;;  %v367_v62 = vmax.f32 %v351_v54, 0.0 }
 0x10a   :  { %812 = vmatpush3.msra.mxu0 %v386_v7  ;;  %893 = vmatpush3.msra.mxu1 %v386_v7  ;;  %v375_v63 = vmax.f32 %v359_v55, 0.0  ;;  %v368_v0 = vmax.f32 %v352_v60, 0.0 }
 0x10b   :  { %813 = vmatprep.subr.mxu0 %v385_v8  ;;  %878 = vmatprep.subr.mxu1 %v385_v8  ;;  %v376_v1 = vmax.f32 %v360_v61, 0.0 }
 0x10c   :  { %814 = vmatpush3.msra.mxu0 %v385_v8  ;;  %894 = vmatpush3.msra.mxu1 %v385_v8 }
 0x10d   :  { %815 = vmatprep.subr.mxu0 %v384_v9  ;;  %879 = vmatprep.subr.mxu1 %v384_v9 }
 0x10e   :  { %816 = vmatpush3.msra.mxu0 %v384_v9  ;;  %895 = vmatpush3.msra.mxu1 %v384_v9 }
 0x10f   :  { %817 = vmatprep.subr.mxu0 %v383_v10  ;;  %880 = vmatprep.subr.mxu1 %v383_v10 }
 0x110   :  { %818 = vmatpush3.msra.mxu0 %v383_v10  ;;  %896 = vmatpush3.msra.mxu1 %v383_v10 }
 0x111   :  { %819 = vmatprep.subr.mxu0 %v382_v11  ;;  %881 = vmatprep.subr.mxu1 %v382_v11 }
 0x112   :  { %820 = vmatpush3.msra.mxu0 %v382_v11  ;;  %897 = vmatpush3.msra.mxu1 %v382_v11 }
 0x113   :  { %821 = vmatprep.subr.mxu0 %v381_v12  ;;  %882 = vmatprep.subr.mxu1 %v381_v12 }
 0x114   :  { %822 = vmatpush3.msra.mxu0 %v381_v12  ;;  %898 = vmatpush3.msra.mxu1 %v381_v12 }
 0x115   :  { %823 = vmatprep.subr.mxu0 %v380_v13  ;;  %883 = vmatprep.subr.mxu1 %v380_v13 }
 0x116   :  { %824 = vmatpush3.msra.mxu0 %v380_v13  ;;  %899 = vmatpush3.msra.mxu1 %v380_v13 }
 0x117   :  { %825 = vmatprep.subr.mxu0 %v379_v19  ;;  %884 = vmatprep.subr.mxu1 %v379_v19 }
 0x118   :  { %826 = vmatpush3.msra.mxu0 %v379_v19  ;;  %900 = vmatpush3.msra.mxu1 %v379_v19 }
 0x119   :  { %827 = vmatprep.subr.mxu0 %v378_v24  ;;  %885 = vmatprep.subr.mxu1 %v378_v24 }
 0x11a   :  { %828 = vmatpush3.msra.mxu0 %v378_v24  ;;  %901 = vmatpush3.msra.mxu1 %v378_v24 }
 0x11b   :  { %829 = vmatprep.subr.mxu0 %v377_v31  ;;  %886 = vmatprep.subr.mxu1 %v377_v31 }
 0x11c   :  { %830 = vmatpush3.msra.mxu0 %v377_v31  ;;  %902 = vmatpush3.msra.mxu1 %v377_v31 }
 0x11d   :  { %831 = vmatprep.mubr.f32.mxu0 %v361_v34  ;;  %843 = vmatprep.mubr.f32.mxu1 %v369_v35 }
 0x11e   :  { %832 = vmatmul.mubr.f32.vlgmr.msra.gmra.mxu0 %v362_v36  ;;  %844 = vmatmul.mubr.f32.vlgmr.msra.gmra.mxu1 %v370_v37 }
 0x11f   :  { %834 = vmatprep.mubr.f32.mxu0 %v363_v40  ;;  %846 = vmatprep.mubr.f32.mxu1 %v371_v41 }
 0x122   :  { %835 = vmatmul.mubr.f32.gmra.mxu0 %v364_v48  ;;  %847 = vmatmul.mubr.f32.gmra.mxu1 %v372_v49 }
 0x123   :  { %837 = vmatprep.mubr.f32.mxu0 %v365_v52  ;;  %849 = vmatprep.mubr.f32.mxu1 %v373_v53 }
 0x126   :  { %838 = vmatmul.mubr.f32.gmra.mxu0 %v366_v58  ;;  %850 = vmatmul.mubr.f32.gmra.mxu1 %v374_v59 }
 0x127   :  { %840 = vmatprep.mubr.f32.mxu0 %v367_v62  ;;  %852 = vmatprep.mubr.f32.mxu1 %v375_v63 }
 0x12a   :  { %841 = vmatmul.mubr.f32.gmra.mxu0 %v368_v0  ;;  %853 = vmatmul.mubr.f32.gmra.mxu1 %v376_v1 }
 0x1de   :  { %v833_v2 = vpop.f32.mrf.mxu0  ;;  %v845_v3 = vpop.f32.mrf.mxu1 }
 0x1e0   :  { %v459_v4 = vpop.f32.mrf.mxu0  ;;  %v499_v5 = vpop.f32.mrf.mxu1 }
 0x1e1   :  { %v675_v6 = vpack.c.bf16 %v833_v2, %v459_v4  ;;  %v695_v7 = vpack.c.bf16 %v845_v3, %v499_v5 }
 0x1e2   :  { %v836_v8 = vpop.f32.mrf.mxu0  ;;  %v848_v9 = vpop.f32.mrf.mxu1 }
 0x1e3   :  { %676 = vst [vmem:[%s1100_s5] sm:$0xff] %v675_v6   ;;  %715 = vst [vmem:[%s1100_s5 + $0x20] sm:$0xff] %v695_v7  }
 0x1e4   :  { %v469_v10 = vpop.f32.mrf.mxu0  ;;  %v509_v11 = vpop.f32.mrf.mxu1 }
 0x1e5   :  { %v680_v12 = vpack.c.bf16 %v836_v8, %v469_v10  ;;  %v700_v13 = vpack.c.bf16 %v848_v9, %v509_v11 }
 0x1e6   :  { %v839_v14 = vpop.f32.mrf.mxu0  ;;  %v851_v15 = vpop.f32.mrf.mxu1 }
 0x1e7   :  { %712 = vst [vmem:[%s1100_s5 + $0x8] sm:$0xff] %v680_v12   ;;  %716 = vst [vmem:[%s1100_s5 + $0x28] sm:$0xff] %v700_v13  }
 0x1e8   :  { %v479_v16 = vpop.f32.mrf.mxu0  ;;  %v519_v17 = vpop.f32.mrf.mxu1 }
 0x1e9   :  { %v685_v18 = vpack.c.bf16 %v839_v14, %v479_v16  ;;  %v705_v19 = vpack.c.bf16 %v851_v15, %v519_v17 }
 0x1ea   :  { %v842_v20 = vpop.f32.mrf.mxu0  ;;  %v854_v21 = vpop.f32.mrf.mxu1 }
 0x1eb   :  { %713 = vst [vmem:[%s1100_s5 + $0x10] sm:$0xff] %v685_v18   ;;  %717 = vst [vmem:[%s1100_s5 + $0x30] sm:$0xff] %v705_v19  }
 0x1ec   :  { %v489_v22 = vpop.f32.mrf.mxu0  ;;  %v529_v23 = vpop.f32.mrf.mxu1 }
 0x1ed   :  { %v690_v24 = vpack.c.bf16 %v842_v20, %v489_v22  ;;  %v710_v25 = vpack.c.bf16 %v854_v21, %v529_v23 }
 0x1ef   :  { %714 = vst [vmem:[%s1100_s5 + $0x18] sm:$0xff] %v690_v24   ;;  %718 = vst [vmem:[%s1100_s5 + $0x38] sm:$0xff] %v710_v25  }

</bundles_post_ra>
